<compile_context>
chip_gen: v7x
topology: tpu7x:2x2x1
jax: 0.10.0
libtpu: 0.0.40
codegen_flags: <defaults>
</compile_context>

<pallas_src>
import jax
import jax.numpy as jnp
import numpy as np
from jax.experimental import pallas as pl
from jax.experimental.pallas import tpu as pltpu

B = 8          # batch
S = 6          # camera state dim (from the module docstring)
A = 3          # action dim (synthetic ActorModel head)
H = 32         # hidden dim of the synthetic MLPs
LANES = 128    # lane width of the packed buffers
GAMMA = 0.98   # satellite_discount

# Row offsets inside the packed parameter buffer (all starts are multiples of 8 so the
# in-kernel sublane slices are aligned).  Total: (216,128) f32 ~= 108 KiB.
_W1 = 0      # rows   0..7  : [wa1 | wc1 | wt1[:6]] in cols 0:31 / 32:63 / 64:95 (rows 0..5)
_BIAS = 8    # rows   8..15 : row 8 = b1, 9 = b2, 10 = b4, 11 = b5 (full 128-lane rows)
_W2 = 16     # rows  16..47 : wa2 (32,3) -> cols 0:2
_W3 = 48     # rows  48..55 : wt1[6:9] (3,32) at rows 48..50 -> cols 64:95
_W4 = 56     # rows  56..87 : reward col wt2[:,6] -> col 64 ; W_tc = wt2[:, :6]@wc1 -> cols 96:127
_W5 = 88     # rows 88..215 : wc2 at rows 120..151 -> col 0 (value), rows 184..215 -> col 1 (v_next)
_PROWS = 216


def _critic_td_kernel(x_ref, p_ref, loss_ref):
    x = x_ref[...]                                  # (B, 6) raw state
    bias = p_ref[_BIAS:_BIAS + 8, :]                # (8, 128) full-lane bias rows

    def dot(a, b):
        return jnp.dot(a, b, preferred_element_type=jnp.float32)

    # dot 1: actor-L1 | critic-L1(state) | transition-L1(state half, incl. bt1) in one pass.
    h_raw = dot(x, p_ref[_W1:_W1 + S, :]) + bias[0:1, :]          # (B, 128)
    h = jnp.maximum(h_raw, 0.0)                                   # lanes 0:31 h_a, 32:63 h_cs

    # dot 2: actor-L2 -> action in lanes 0:2 (every other lane is tanh(0+0) = 0).
    action = jnp.tanh(dot(h[:, 0:H], p_ref[_W2:_W2 + H, :]) + bias[1:2, :])   # (B, 128)

    # dot 3: transition-L1 action half (N placed at lanes 64:95 to line up with h_raw's
    # state half).  h_t = ReLU(state@wt1[:6] + bt1 + action@wt1[6:9]) lives in lanes 64:95.
    t_act = dot(action[:, 0:8], p_ref[_W3:_W3 + 8, :])            # (B, 128)
    t_full = jnp.maximum(h_raw + t_act, 0.0)

    # dot 4: transition-L2 fused with critic-L1(next_state):
    #   lane 64      = reward (raw, no ReLU)
    #   lanes 96:127 = next_state@wc1 + bc1  (critic-L1 pre-activation)
    f4 = dot(t_full[:, 2 * H:3 * H], p_ref[_W4:_W4 + H, :]) + bias[2:3, :]    # (B, 128)
    reward = f4[:, 2 * H:2 * H + 1]                               # (B, 1) raw reward

    # Lane-pack both critic hidden activations: h_cs stays at lanes 32:63 (from h),
    # h_cn = ReLU(f4) lands at lanes 96:127.  All other lanes hit zero rows of W5.
    combined = h + jnp.maximum(f4, 0.0)                           # (B, 128)

    # dot 5: critic-L2 for state (col 0) and next_state (col 1) in one pass.
    c2 = dot(combined, p_ref[_W5:_W5 + LANES, :]) + bias[3:4, :]  # (B, 128)
    value = c2[:, 0:1]
    v_next = c2[:, 1:2]

    diff = value - (reward + GAMMA * v_next)                      # (B, 1)
    # MSELoss(reduction='mean') over the real (B,1) outputs.
    loss_ref[...] = jnp.sum(diff * diff, keepdims=True) * (1.0 / B)


def pack_params(p):
    """Pack all weights/biases (incl. the pre-multiplied transition-L2 @ critic-L1 block)
    into one contiguous (216,128) f32 buffer.  Done ONCE outside the per-call path."""
    hi = jax.lax.Precision.HIGHEST
    W_tc = jnp.dot(p["wt2"][:, :S], p["wc1"], precision=hi)               # (32, 32)
    b_tc = jnp.dot(p["bt2"][:S], p["wc1"], precision=hi) + p["bc1"]       # (32,)

    buf = jnp.zeros((_PROWS, LANES), jnp.float32)

    # dot-1 weights: actor-L1 | critic-L1 | transition-L1 (state rows).
    buf = buf.at[_W1:_W1 + S, 0:H].set(p["wa1"])
    buf = buf.at[_W1:_W1 + S, H:2 * H].set(p["wc1"])
    buf = buf.at[_W1:_W1 + S, 2 * H:3 * H].set(p["wt1"][:S, :])
    # dot-2 weights: actor-L2 -> lanes 0:2.
    buf = buf.at[_W2:_W2 + H, 0:A].set(p["wa2"])
    # dot-3 weights: transition-L1 (action rows) -> lanes 64:95.
    buf = buf.at[_W3:_W3 + A, 2 * H:3 * H].set(p["wt1"][S:, :])
    # dot-4 weights: reward column -> lane 64, fused W_tc -> lanes 96:127.
    buf = buf.at[_W4:_W4 + H, 2 * H].set(p["wt2"][:, S])
    buf = buf.at[_W4:_W4 + H, 3 * H:4 * H].set(W_tc)
    # dot-5 weights: wc2 twice (value from lanes 32:63, v_next from lanes 96:127).
    buf = buf.at[_W5 + H:_W5 + 2 * H, 0].set(p["wc2"][:, 0])
    buf = buf.at[_W5 + 3 * H:_W5 + 4 * H, 1].set(p["wc2"][:, 0])

    # Bias rows (full 128-lane rows).
    buf = buf.at[_BIAS + 0, 0:H].set(p["ba1"])
    buf = buf.at[_BIAS + 0, H:2 * H].set(p["bc1"])
    buf = buf.at[_BIAS + 0, 2 * H:3 * H].set(p["bt1"])
    buf = buf.at[_BIAS + 1, 0:A].set(p["ba2"])
    buf = buf.at[_BIAS + 2, 2 * H].set(p["bt2"][S])
    buf = buf.at[_BIAS + 2, 3 * H:4 * H].set(b_tc)
    buf = buf.at[_BIAS + 3, 0].set(p["bc2"][0])
    buf = buf.at[_BIAS + 3, 1].set(p["bc2"][0])
    return buf


@jax.jit
def critic_td_loss(state, packed_params):
    """state: (B,6) f32; packed_params: (216,128) f32 from pack_params. Returns scalar TD loss."""
    loss = pl.pallas_call(
        _critic_td_kernel,
        out_shape=jax.ShapeDtypeStruct((1, 1), jnp.float32),
        in_specs=[
            pl.BlockSpec(memory_space=pltpu.MemorySpace.VMEM),   # raw (B,6) state, no pre-pad
            pl.BlockSpec(memory_space=pltpu.MemorySpace.VMEM),   # packed params (VMEM resident)
        ],
        out_specs=pl.BlockSpec(memory_space=pltpu.MemorySpace.VMEM),
    )(state, packed_params)
    return loss[0, 0]


def reference_loss(state, p):
    """Pure-JAX reference mirroring the PyTorch forward exactly."""
    ha = jax.nn.relu(state @ p["wa1"] + p["ba1"])
    action = jnp.tanh(ha @ p["wa2"] + p["ba2"])
    ht = jax.nn.relu(jnp.concatenate([state, action], axis=-1) @ p["wt1"] + p["bt1"])
    out = ht @ p["wt2"] + p["bt2"]
    next_state, reward = out[:, :S], out[:, S:S + 1]

    def critic(z):
        hc = jax.nn.relu(z @ p["wc1"] + p["bc1"])
        return hc @ p["wc2"] + p["bc2"]

    td_target = reward + GAMMA * critic(next_state)
    value = critic(state)
    return jnp.mean((value - td_target) ** 2)


def init_params(key):
    ks = jax.random.split(key, 12)
    n = lambda k, shape: (0.1 * jax.random.normal(k, shape)).astype(jnp.float32)
    return {
        "wa1": n(ks[0], (S, H)),       "ba1": n(ks[1], (H,)),
        "wa2": n(ks[2], (H, A)),       "ba2": n(ks[3], (A,)),
        "wt1": n(ks[4], (S + A, H)),   "bt1": n(ks[5], (H,)),
        "wt2": n(ks[6], (H, S + 1)),   "bt2": n(ks[7], (S + 1,)),
        "wc1": n(ks[8], (S, H)),       "bc1": n(ks[9], (H,)),
        "wc2": n(ks[10], (H, 1)),      "bc2": n(ks[11], (1,)),
    }


if __name__ == "__main__":
    key = jax.random.PRNGKey(0)
    k_state, k_params = jax.random.split(key)
    state = jax.random.normal(k_state, (B, S), dtype=jnp.float32)
    params = init_params(k_params)

    packed = jax.block_until_ready(pack_params(params))   # one-time host-side packing

    loss = jax.block_until_ready(critic_td_loss(state, packed))
    ref = jax.block_until_ready(reference_loss(state, params))

    # Pre-multiplying wt2[:, :6] @ wc1 reassociates floats -> allow ~1e-5 absolute slack.
    assert np.allclose(np.asarray(loss), np.asarray(ref), rtol=1e-4, atol=1e-5), (loss, ref)
    print("KERNEL_OK")
</pallas_src>

<mosaic_0001>
module attributes {stable_mosaic.version = 11 : i64} {
  func.func @_critic_td_kernel(%arg0: memref<8x6xf32, #tpu.memory_space<vmem>>, %arg1: memref<216x128xf32, #tpu.memory_space<vmem>>, %arg2: memref<1x1xf32, #tpu.memory_space<vmem>>) attributes {dimension_semantics = [], scalar_prefetch = 0 : i64, scratch_operands = 0 : i64, tpu.core_type = #tpu.core_type<tc>} {
    %c0 = arith.constant 0 : index
    %c0_0 = arith.constant 0 : index
    %0 = vector.load %arg0[%c0, %c0_0] : memref<8x6xf32, #tpu.memory_space<vmem>>, vector<8x6xf32>
    %c8 = arith.constant 8 : index
    %c0_1 = arith.constant 0 : index
    %1 = vector.load %arg1[%c8, %c0_1] : memref<216x128xf32, #tpu.memory_space<vmem>>, vector<8x128xf32>
    %c0_2 = arith.constant 0 : index
    %c0_3 = arith.constant 0 : index
    %2 = vector.load %arg1[%c0_2, %c0_3] : memref<216x128xf32, #tpu.memory_space<vmem>>, vector<6x128xf32>
    %cst = arith.constant dense<0.000000e+00> : vector<8x128xf32>
    %3 = tpu.matmul %0, %2, %cst {dimension_numbers = #tpu.dot_dimension_numbers<[1], [0], [0], [1], [0, 0, 1, 1], [], []>} : vector<8x6xf32>, vector<6x128xf32>, vector<8x128xf32> -> vector<8x128xf32>
    %4 = vector.extract_strided_slice %1 {offsets = [0, 0], sizes = [1, 128], strides = [1, 1]} : vector<8x128xf32> to vector<1x128xf32>
    %5 = vector.broadcast %4 : vector<1x128xf32> to vector<8x128xf32>
    %6 = arith.addf %3, %5 : vector<8x128xf32>
    %cst_4 = arith.constant 0.000000e+00 : f32
    %7 = vector.broadcast %cst_4 : f32 to vector<8x128xf32>
    %8 = arith.maximumf %6, %7 : vector<8x128xf32>
    %9 = vector.extract_strided_slice %8 {offsets = [0, 0], sizes = [8, 32], strides = [1, 1]} : vector<8x128xf32> to vector<8x32xf32>
    %c16 = arith.constant 16 : index
    %c0_5 = arith.constant 0 : index
    %10 = vector.load %arg1[%c16, %c0_5] : memref<216x128xf32, #tpu.memory_space<vmem>>, vector<32x128xf32>
    %cst_6 = arith.constant dense<0.000000e+00> : vector<8x128xf32>
    %11 = tpu.matmul %9, %10, %cst_6 {dimension_numbers = #tpu.dot_dimension_numbers<[1], [0], [0], [1], [0, 0, 1, 1], [], []>} : vector<8x32xf32>, vector<32x128xf32>, vector<8x128xf32> -> vector<8x128xf32>
    %12 = vector.extract_strided_slice %1 {offsets = [1, 0], sizes = [1, 128], strides = [1, 1]} : vector<8x128xf32> to vector<1x128xf32>
    %13 = vector.broadcast %12 : vector<1x128xf32> to vector<8x128xf32>
    %14 = arith.addf %11, %13 : vector<8x128xf32>
    %15 = math.tanh %14 : vector<8x128xf32>
    %16 = vector.extract_strided_slice %15 {offsets = [0, 0], sizes = [8, 8], strides = [1, 1]} : vector<8x128xf32> to vector<8x8xf32>
    %c48 = arith.constant 48 : index
    %c0_7 = arith.constant 0 : index
    %17 = vector.load %arg1[%c48, %c0_7] : memref<216x128xf32, #tpu.memory_space<vmem>>, vector<8x128xf32>
    %cst_8 = arith.constant dense<0.000000e+00> : vector<8x128xf32>
    %18 = tpu.matmul %16, %17, %cst_8 {dimension_numbers = #tpu.dot_dimension_numbers<[1], [0], [0], [1], [0, 0, 1, 1], [], []>} : vector<8x8xf32>, vector<8x128xf32>, vector<8x128xf32> -> vector<8x128xf32>
    %19 = arith.addf %6, %18 : vector<8x128xf32>
    %cst_9 = arith.constant 0.000000e+00 : f32
    %20 = vector.broadcast %cst_9 : f32 to vector<8x128xf32>
    %21 = arith.maximumf %19, %20 : vector<8x128xf32>
    %22 = vector.extract_strided_slice %21 {offsets = [0, 64], sizes = [8, 32], strides = [1, 1]} : vector<8x128xf32> to vector<8x32xf32>
    %c56 = arith.constant 56 : index
    %c0_10 = arith.constant 0 : index
    %23 = vector.load %arg1[%c56, %c0_10] : memref<216x128xf32, #tpu.memory_space<vmem>>, vector<32x128xf32>
    %cst_11 = arith.constant dense<0.000000e+00> : vector<8x128xf32>
    %24 = tpu.matmul %22, %23, %cst_11 {dimension_numbers = #tpu.dot_dimension_numbers<[1], [0], [0], [1], [0, 0, 1, 1], [], []>} : vector<8x32xf32>, vector<32x128xf32>, vector<8x128xf32> -> vector<8x128xf32>
    %25 = vector.extract_strided_slice %1 {offsets = [2, 0], sizes = [1, 128], strides = [1, 1]} : vector<8x128xf32> to vector<1x128xf32>
    %26 = vector.broadcast %25 : vector<1x128xf32> to vector<8x128xf32>
    %27 = arith.addf %24, %26 : vector<8x128xf32>
    %28 = vector.extract_strided_slice %27 {offsets = [0, 64], sizes = [8, 1], strides = [1, 1]} : vector<8x128xf32> to vector<8x1xf32>
    %cst_12 = arith.constant 0.000000e+00 : f32
    %29 = vector.broadcast %cst_12 : f32 to vector<8x128xf32>
    %30 = arith.maximumf %27, %29 : vector<8x128xf32>
    %31 = arith.addf %8, %30 : vector<8x128xf32>
    %c88 = arith.constant 88 : index
    %c0_13 = arith.constant 0 : index
    %32 = vector.load %arg1[%c88, %c0_13] : memref<216x128xf32, #tpu.memory_space<vmem>>, vector<128x128xf32>
    %cst_14 = arith.constant dense<0.000000e+00> : vector<8x128xf32>
    %33 = tpu.matmul %31, %32, %cst_14 {dimension_numbers = #tpu.dot_dimension_numbers<[1], [0], [0], [1], [0, 0, 1, 1], [], []>} : vector<8x128xf32>, vector<128x128xf32>, vector<8x128xf32> -> vector<8x128xf32>
    %34 = vector.extract_strided_slice %1 {offsets = [3, 0], sizes = [1, 128], strides = [1, 1]} : vector<8x128xf32> to vector<1x128xf32>
    %35 = vector.broadcast %34 : vector<1x128xf32> to vector<8x128xf32>
    %36 = arith.addf %33, %35 : vector<8x128xf32>
    %37 = vector.extract_strided_slice %36 {offsets = [0, 0], sizes = [8, 1], strides = [1, 1]} : vector<8x128xf32> to vector<8x1xf32>
    %38 = vector.extract_strided_slice %36 {offsets = [0, 1], sizes = [8, 1], strides = [1, 1]} : vector<8x128xf32> to vector<8x1xf32>
    %cst_15 = arith.constant 9.800000e-01 : f32
    %39 = vector.broadcast %cst_15 : f32 to vector<8x1xf32>
    %40 = arith.mulf %39, %38 : vector<8x1xf32>
    %41 = arith.addf %28, %40 : vector<8x1xf32>
    %42 = arith.subf %37, %41 : vector<8x1xf32>
    %43 = arith.mulf %42, %42 : vector<8x1xf32>
    %44 = vector.shape_cast %43 : vector<8x1xf32> to vector<1x8x1xf32>
    %cst_16 = arith.constant dense<0.000000e+00> : vector<1xf32>
    %45 = vector.multi_reduction <add>, %44, %cst_16 [1, 2] : vector<1x8x1xf32> to vector<1xf32>
    %46 = vector.shape_cast %45 : vector<1xf32> to vector<1x1x1xf32>
    %47 = vector.extract %46[0, 0, 0] : f32 from vector<1x1x1xf32>
    %48 = vector.broadcast %47 : f32 to vector<1x1xf32>
    %cst_17 = arith.constant 1.250000e-01 : f32
    %49 = vector.broadcast %cst_17 : f32 to vector<1x1xf32>
    %50 = arith.mulf %48, %49 : vector<1x1xf32>
    %c0_18 = arith.constant 0 : index
    %c0_19 = arith.constant 0 : index
    %51 = vector.load %arg2[%c0_18, %c0_19] : memref<1x1xf32, #tpu.memory_space<vmem>>, vector<1x1xf32>
    tpu.vector_store %arg2[%c0_18, %c0_19], %50 {strides = array<i32>} : memref<1x1xf32, #tpu.memory_space<vmem>>, vector<1x1xf32>,
    return
  }
}

</mosaic_0001>

<bundles_post_ra>
// kernel: critic_td_loss.1
= control target key start
LH: loop header
LB: loop body
LE: loop exit
PB: predicated region body
PF: predicated region fallthrough
CT: control target
= control target key end

     0   :  { %7 = vsyncpa [#allocation3], 0  ;;  %s836_s0 = inlined_call_operand.hbm [shape: f32[8,6], index: 0, kind: input, shape index: {}]   ;;  %s837_s1 = inlined_call_operand.hbm [shape: f32[216,128], index: 1, kind: input, shape index: {}]   ;;  %s838_s2 = inlined_call_operand.hbm [shape: f32[1,1], index: 2, kind: output, shape index: {}]  }
   0x1   :  { %8 = vsyncpa [#allocation6], 0 }
   0x2   :  { %9 = vsyncpa [#allocation4], 0  ;;  %s727_s9 = smov [#allocation2]   ;;  %s728_s11 = smov [#allocation5]  }
   0x3   :  { %s16_s10 = sshll.u32 %s727_s9, 4  ;;  %s25_s12 = sshll.u32 %s728_s11, 4  ;;  %s17_s10 = int_to_ptr.vmem [resolvable:$true] %s16_s10  ;;  %s752_s12 = int_to_ptr.vmem [resolvable:$true] %s25_s12 }
   0x4   :  { %s655_s15 = scalar_lea.hbm %s836_s0, 128 }
   0x5   :  { %p656_p0 = scmp.ne.s32.totalorder %s836_s0, %s655_s15  ;;  %p659_p1 = scmp.lt.u32.totalorder %s655_s15, %s836_s0 }
   0x7   :  { %p661_p2 = pnand %p659_p1, %p656_p0 }
   0x9   :  { %664 = shalt.err (!%p661_p2)
}
   0xa   :  { %s665_s20 = scalar_lea.vmem %s17_s10, 128  ;;  %p670_p4 = scmp.lt.s32.totalorder %s17_s10, %s17_s10 }
   0xb   :  { %p666_p3 = scmp.ne.s32.totalorder %s17_s10, %s665_s20  ;;  %p671_p5 = scmp.lt.s32.totalorder %s665_s20, %s665_s20 }
   0xd   :  { %p672_p6 = por %p671_p5, %p670_p4 }
   0xf   :  { %p673_p7 = pnand %p672_p6, %p666_p3 }
  0x11   :  { %676 = shalt.err (!%p673_p7)
}
  0x12   :  { %19 = dma.hbm_to_vmem [thread:$0]  %s836_s0, 128, %s17_s10, [#allocation3]  }
  0x13   :  { %s677_s25 = scalar_lea.hbm %s837_s1, 3456 }
  0x14   :  { %p678_p8 = scmp.ne.s32.totalorder %s837_s1, %s677_s25  ;;  %p681_p9 = scmp.lt.u32.totalorder %s677_s25, %s837_s1 }
  0x16   :  { %p683_p10 = pnand %p681_p9, %p678_p8 }
  0x18   :  { %686 = shalt.err (!%p683_p10)
}
  0x19   :  { %s687_s30 = scalar_lea.vmem %s752_s12, 3456  ;;  %p692_p12 = scmp.lt.s32.totalorder %s752_s12, %s752_s12 }
  0x1a   :  { %p688_p11 = scmp.ne.s32.totalorder %s752_s12, %s687_s30  ;;  %p693_p13 = scmp.lt.s32.totalorder %s687_s30, %s687_s30 }
  0x1c   :  { %p694_p0 = por %p693_p13, %p692_p12 }
  0x1e   :  { %p695_p1 = pnand %p694_p0, %p688_p11 }
  0x20   :  { %698 = shalt.err (!%p695_p1)
}
  0x21   :  { %s729_s0 = smov 128   ;;  %s730_s3 = smov 8  }
  0x22   :  { %31 = dma.hbm_to_vmem [thread:$0]  %s837_s1, 3456, %s752_s12, [#allocation6], %s729_s0, %s729_s0, %s730_s3  }
  0x23   :  { %721 = dma.done.wait [#allocation3], 128  }
  0x24   :  { %722 = vsyncadd [#allocation3], 4294967168 }
  0x25   :  { %723 = dma.done.wait [#allocation6], 3456  }
  0x26   :  { %724 = vsyncadd [#allocation6], 4294963840  ;;  %v731_v0 = vmov 0.0   ;;  %vm732_vm0 = vmmov 0   ;;  %v733_v1 = vmov 0.0|0.0   ;;  %vm49_vm1 = vcmask 1045504  }
  0x27   :  { %538 = vmatprep.subr.mxu0 %v731_v0  ;;  %540 = vmatprep.mubr.msk.f32.mxu0 %vm732_vm0, %v731_v0  ;;  %vm45_vm2 = vcmask 48128   ;;  %v40_v2 = vld [vmem:[#allocation5] sm:$0x3f]  ;;  %v38_v3 = vld [vmem:[#allocation2] sm:$0xff]  ;;  %v124_v4 = vld [vmem:[#allocation5 + $0x10] sm:$0xff]  ;;  %v41_v10 = vlaneseq  ;;  %vm132_vm3 = vcmask 261120  }
  0x28   :  { %617 = vmatprep.subr.bf16.mxu1 %v733_v1  ;;  %602 = vmatprep.mubr.msk.f32.mxu1 %vm732_vm0, %v731_v0  ;;  %v125_v5 = vld [vmem:[#allocation5 + $0x18] sm:$0xff]  ;;  %v126_v7 = vld [vmem:[#allocation5 + $0x20] sm:$0xff]  ;;  %v127_v8 = vld [vmem:[#allocation5 + $0x28] sm:$0xff]  ;;  %vm208_vm4 = vcmask 64512   ;;  %s734_s1 = smov 64   ;;  %s735_s6 = smov 63  }
  0x29   :  { %539 = vmatpush3.msk.msra.mxu0 %vm49_vm1, %v40_v2  ;;  %v606_v6 = vpack.c.bf16 %v125_v5, %v124_v4  ;;  %v609_v9 = vpack.c.bf16 %v127_v8, %v126_v7  ;;  %v789_v11 = vshrl.u32 %v41_v10, 7  ;;  %v792_v13 = vld [vmem:[#allocation5 + $0x8] sm:$0xff]  ;;  %v207_v19 = vld [vmem:[#allocation5 + $0x30] sm:$0xff]  ;;  %v284_v26 = vld [vmem:[#allocation5 + $0x38] sm:$0xff]  ;;  %vm471_vm5 = vcmask 7168   ;;  %s736_s7 = smov [#allocation7]  }
  0x2a   :  { %541 = vmatmul.mubr.msk.f32.vlgmr.msra.gmra.mrb[0].mxu0 %vm45_vm2, %v38_v3  ;;  %605 = vmatprep.subr.bf16.mxu0 %v733_v1  ;;  %v285_v27 = vld [vmem:[#allocation5 + $0x40] sm:$0xff]  ;;  %v286_v28 = vld [vmem:[#allocation5 + $0x48] sm:$0xff]  ;;  %v287_v30 = vld [vmem:[#allocation5 + $0x50] sm:$0xff]  ;;  %s492_s8 = sshll.u32 %s736_s7, 4  ;;  %vm484_vm6 = vcmask 0   ;;  %s493_s8 = int_to_ptr.vmem [resolvable:$true] %s492_s8 }
  0x2b   :  { %551 = vmatprep.mubr.msk.f32.mxu0 %vm732_vm0, %v731_v0  ;;  %607 = vmatpush3.bf16.msra.mxu0 %v606_v6  ;;  %v43_v12 = vsub.s32 0, %v789_v11  ;;  %v130_v20 = vsub.s32 1, %v789_v11  ;;  %v612_v29 = vpack.c.bf16 %v285_v27, %v284_v26  ;;  %v615_v31 = vpack.c.bf16 %v287_v30, %v286_v28  ;;  %v369_v32 = vld [vmem:[#allocation5 + $0x58] sm:$0xff]  ;;  %v370_v33 = vld [vmem:[#allocation5 + $0x60] sm:$0xff]  ;;  %v371_v34 = vld [vmem:[#allocation5 + $0x68] sm:$0xff]  ;;  %s699_s10 = scalar_lea.vmem %s493_s8, 16  ;;  %p704_p3 = scmp.lt.s32.totalorder %s493_s8, %s493_s8 }
  0x2c   :  { %608 = vmatprep.subr.bf16.mxu0 %v733_v1  ;;  %v618_v35 = vpack.c.bf16 %v370_v33, %v369_v32  ;;  %v372_v36 = vld [vmem:[#allocation5 + $0x70] sm:$0xff]  ;;  %v373_v38 = vld [vmem:[#allocation5 + $0x78] sm:$0xff]  ;;  %v374_v39 = vld [vmem:[#allocation5 + $0x80] sm:$0xff]  ;;  %v290_v61 = vsub.s32 2, %v789_v11  ;;  %v387_v5 = vsub.s32 3, %v789_v11  ;;  %p700_p2 = scmp.ne.s32.totalorder %s493_s8, %s699_s10  ;;  %s703_s11 = scalar_lea.vmem %s493_s8, 32 }
  0x2d   :  { %v44_v14 = vrot.slane %v792_v13, %v43_v12  ;;  %v131_v21 = vrot.slane %v792_v13, %v130_v20  ;;  %v621_v37 = vpack.c.bf16 %v372_v36, %v371_v34  ;;  %v624_v40 = vpack.c.bf16 %v374_v39, %v373_v38  ;;  %v375_v42 = vld [vmem:[#allocation5 + $0x88] sm:$0xff]  ;;  %v376_v43 = vld [vmem:[#allocation5 + $0x90] sm:$0xff]  ;;  %v377_v48 = vld [vmem:[#allocation5 + $0x98] sm:$0xff]  ;;  %p705_p4 = scmp.lt.s32.totalorder %s703_s11, %s699_s10 }
  0x2e   :  { %619 = vmatpush3.bf16.msra.mxu1 %v618_v35  ;;  %v627_v47 = vpack.c.bf16 %v376_v43, %v375_v42  ;;  %v378_v49 = vld [vmem:[#allocation5 + $0xa0] sm:$0xff]  ;;  %v379_v51 = vld [vmem:[#allocation5 + $0xa8] sm:$0xff]  ;;  %v380_v52 = vld [vmem:[#allocation5 + $0xb0] sm:$0xff]  ;;  %v291_v62 = vrot.slane %v792_v13, %v290_v61 }
  0x2f   :  { %610 = vmatpush3.bf16.msra.mxu0 %v609_v9  ;;  %620 = vmatprep.subr.bf16.mxu1 %v733_v1  ;;  %v630_v50 = vpack.c.bf16 %v378_v49, %v377_v48  ;;  %v633_v53 = vpack.c.bf16 %v380_v52, %v379_v51  ;;  %v381_v55 = vld [vmem:[#allocation5 + $0xb8] sm:$0xff]  ;;  %v382_v56 = vld [vmem:[#allocation5 + $0xc0] sm:$0xff]  ;;  %v383_v58 = vld [vmem:[#allocation5 + $0xc8] sm:$0xff]  ;;  %p706_p5 = por %p705_p4, %p704_p3 }
  0x30   :  { %554 = vmatprep.subr.mxu0 %v731_v0  ;;  %v636_v57 = vpack.c.bf16 %v382_v56, %v381_v55  ;;  %v384_v59 = vld [vmem:[#allocation5 + $0xd0] sm:$0xff] }
  0x31   :  { %v639_v60 = vpack.c.bf16 %v384_v59, %v383_v58  ;;  %p707_p6 = pnand %p706_p5, %p700_p2 }
  0x32   :  { %622 = vmatpush3.bf16.msra.mxu1 %v621_v37 }
  0x33   :  { %623 = vmatprep.subr.bf16.mxu1 %v733_v1 }
  0x36   :  { %625 = vmatpush3.bf16.msra.mxu1 %v624_v40 }
  0x37   :  { %626 = vmatprep.subr.bf16.mxu1 %v733_v1 }
  0x3a   :  { %628 = vmatpush3.bf16.msra.mxu1 %v627_v47 }
  0x3b   :  { %629 = vmatprep.subr.bf16.mxu1 %v733_v1 }
  0x3e   :  { %631 = vmatpush3.bf16.msra.mxu1 %v630_v50 }
  0x3f   :  { %632 = vmatprep.subr.bf16.mxu1 %v733_v1 }
  0x42   :  { %634 = vmatpush3.bf16.msra.mxu1 %v633_v53 }
  0x43   :  { %635 = vmatprep.subr.bf16.mxu1 %v733_v1 }
  0x46   :  { %637 = vmatpush3.bf16.msra.mxu1 %v636_v57 }
  0x47   :  { %638 = vmatprep.subr.bf16.mxu1 %v733_v1 }
  0x4a   :  { %640 = vmatpush3.bf16.msra.mxu1 %v639_v60 }
  0xfd   :  { %v119_v15 = vpop.f32.mrb[0].mxu0 }
  0xfe   :  { %v795_v16 = vadd.f32 %v119_v15, %v44_v14  ;;  %v542_v17 = vpop.f32.mrb[1].mxu0 }
 0x100   :  { %v123_v18 = vmax.f32 %v795_v16, 0.0 }
 0x102   :  { %552 = vmatmul.mubr.msk.f32.vlgmr.msra.gmra.mrb[2].mxu0 %vm132_vm3, %v123_v18 }
 0x103   :  { %556 = vmatprep.mubr.msk.f32.mxu0 %vm732_vm0, %v731_v0  ;;  %555 = vmatpush3.msra.mxu0 %v207_v19 }
 0x104   :  { %611 = vmatprep.subr.bf16.mxu0 %v733_v1 }
 0x1d5   :  { %v202_v22 = vpop.f32.mrb[2].mxu0 }
 0x1d6   :  { %v203_v23 = vadd.f32 %v202_v22, %v131_v21  ;;  %v553_v24 = vpop.f32.mrb[3].mxu0 }
 0x1d8   :  { %653 = vtanh.f32 %v203_v23 }
 0x1e2   :  { %v654_v25 = vpop.eup %653 }
 0x1e3   :  { %557 = vmatmul.mubr.msk.f32.vlgmr.msra.gmra.mrb[4].mxu0 %vm208_vm4, %v654_v25 }
 0x1e4   :  { %567 = vmatprep.mubr.msk.f32.mxu0 %vm732_vm0, %v731_v0  ;;  %613 = vmatpush3.bf16.msra.mxu0 %v612_v29 }
 0x1e5   :  { %614 = vmatprep.subr.bf16.mxu0 %v733_v1  ;;  %v388_v1 = vrot.slane %v792_v13, %v387_v5 }
 0x1e8   :  { %616 = vmatpush3.bf16.msra.mxu0 %v615_v31 }
 0x2b6   :  { %v278_v41 = vpop.f32.mrb[4].mxu0 }
 0x2b7   :  { %v282_v44 = vadd.f32 %v278_v41, %v795_v16  ;;  %v558_v45 = vpop.f32.mrb[5].mxu0 }
 0x2b9   :  { %v283_v46 = vmax.f32 %v282_v44, 0.0 }
 0x2bb   :  { %293 = vrot.lane.b32.xlu0 %v283_v46, %s734_s1 }
 0x32d   :  { %v294_v54 = vpop.permute.xlu0 %293 }
 0x32e   :  { %568 = vmatmul.mubr.msk.f32.vlgmr.msra.gmra.mrb[6].mxu0 %vm132_vm3, %v294_v54 }
 0x401   :  { %v363_v63 = vpop.f32.mrb[6].mxu0 }
 0x402   :  { %v364_v0 = vadd.f32 %v363_v63, %v291_v62  ;;  %v569_v2 = vpop.f32.mrb[7].mxu0 }
 0x404   :  { %v367_v3 = vmax.f32 %v364_v0, 0.0 }
 0x406   :  { %v368_v4 = vadd.f32 %v367_v3, %v123_v18 }
 0x408   :  { %603 = vmatmul.mubr.f32.vlgmr.msra.gmra.mrb[0].mxu1 %v368_v4 }
 0x4db   :  { %v455_v6 = vpop.f32.mrb[0].mxu1 }
 0x4dc   :  { %v456_v7 = vadd.f32 %v455_v6, %v388_v1  ;;  %v604_v8 = vpop.f32.mrb[1].mxu1 }
 0x4de   :  { %v459_v9 = vmul.f32 0.98, %v456_v7 }
 0x4e0   :  { %461 = vrot.lane.b32.xlu0 %v459_v9, %s735_s6 }
 0x552   :  { %v462_v10 = vpop.permute.xlu0 %461 }
 0x553   :  { %v464_v12 = vadd.f32 %v462_v10, %v364_v0 }
 0x555   :  { %466 = vrot.lane.b32.xlu1 %v464_v12, %s734_s1 }
 0x5c7   :  { %v467_v14 = vpop.permute.xlu1 %466 }
 0x5c8   :  { %v469_v15 = vsub.f32 %v456_v7, %v467_v14 }
 0x5ca   :  { %v470_v16 = vmul.f32 %v469_v15, %v469_v15 }
 0x5cc   :  { %v472_v17 = vsel %vm471_vm5, %v470_v16, 0.0 }
 0x5cd   :  { %473 = vadd.xlane.f32.xlu1 %v472_v17 }
 0x65a   :  { %v474_v18 = vpop.xlane.xlu1 %473 }
 0x65b   :  { %v475_v11 = vrot.slane %v474_v18, 4 }
 0x65d   :  { %v476_v19 = vadd.f32 %v475_v11, %v474_v18 }
 0x65f   :  { %v477_v13 = vrot.slane %v476_v19, 2 }
 0x661   :  { %v478_v20 = vadd.f32 %v477_v13, %v476_v19 }
 0x663   :  { %v479_v21 = vrot.slane %v478_v20, 1 }
 0x665   :  { %v480_v22 = vadd.f32 %v479_v21, %v478_v20 }
 0x667   :  { %641 = vpush %v480_v22 }
 0x698   :  { %s642_s9 = spop %641 }
 0x699   :  { %v482_v23 = vstv %s642_s9 }
 0x69a   :  { %v483_v24 = vmul.f32 0.125, %v482_v23 }
 0x69c   :  { %485 = vst.msk [vmem:[#allocation7] sm:$0x1] %vm484_vm6, %v483_v24 }
 0x69d   :  { %710 = shalt.err (!%p707_p6)
}
 0x69e   :  { %s711_s14 = scalar_lea.hbm %s838_s2, 16 }
 0x69f   :  { %p712_p7 = scmp.ne.s32.totalorder %s838_s2, %s711_s14  ;;  %p715_p8 = scmp.lt.u32.totalorder %s711_s14, %s838_s2 }
 0x6a1   :  { %p717_p9 = pnand %p715_p8, %p712_p7 }
 0x6a3   :  { %720 = shalt.err (!%p717_p9)
}
 0x6a4   :  { %495 = dma.vmem_to_hbm [thread:$0]  %s493_s8, 16, %s838_s2, [#allocation4]  }
 0x6a5   :  { %725 = dma.done.wait [#allocation4], 16  }
 0x6a6   :  { %726 = vsyncadd [#allocation4], 4294967280 }
 0x6a7   :  { %499 = vsyncpa [#allocation3], 1 }
 0x6a8   :  { %500 = vsyncpa [#allocation6], 1 }
 0x6a9   :  { %501 = vsyncpa [#allocation4], 1 }

</bundles_post_ra>
